<compile_context>
chip_gen: v5e
topology: v5e:2x2
jax: 0.10.0
libtpu: 0.0.40
codegen_flags: <defaults>
</compile_context>

<pallas_src>
import functools

import numpy as np
import jax
import jax.numpy as jnp
from jax import lax
from jax.experimental import pallas as pl
from jax.experimental.pallas import tpu as pltpu

KH = KW = 3          # conv kernel size
POOL = 5             # avg-pool window
POOL_STRIDE = 3      # avg-pool stride


@functools.lru_cache(maxsize=None)
def _pool_matrix(H, W, PH, PW):
    """(H*W, PH*PW) avg-pool matrix over the conv output laid out on the *full*
    H*W grid; rows for invalid ("garbage") positions stay zero."""
    m = np.zeros((H * W, PH * PW), np.float32)
    inv = 1.0 / (POOL * POOL)
    for ph in range(PH):
        for pw in range(PW):
            for dh in range(POOL):
                for dw in range(POOL):
                    oh = ph * POOL_STRIDE + dh
                    ow = pw * POOL_STRIDE + dw
                    m[oh * W + ow, ph * PW + pw] = inv
    return m


@jax.jit
def cnn64x3_forward(x, weight, bias):
    """x: (N, C, H, W) f32, weight: (OC, C, 3, 3) f32, bias: (OC,) f32."""
    N, C, H, W = x.shape
    OC = weight.shape[0]
    OH, OW = H - KH + 1, W - KW + 1
    PH = (OH - POOL) // POOL_STRIDE + 1
    PW = (OW - POOL) // POOL_STRIDE + 1
    HW = H * W
    PP = PH * PW
    NT = KH * KW                         # 9 conv taps
    K = NT * C                           # contraction rows from the taps
    KBP = ((K + 1 + 7) // 8) * 8         # + bias row, padded to multiple of 8

    # ---- parameter packing (trace-time constants under jit) ----------------
    # Tap-major, channel-minor rows: row (kh*KW+kw)*C + c <-> weight[:, c, kh, kw]
    wmat = weight.transpose(0, 2, 3, 1).reshape(OC, K)
    w_aug = jnp.concatenate(
        [wmat, bias.reshape(OC, 1),
         jnp.zeros((OC, KBP - K - 1), wmat.dtype)], axis=1)          # (OC, KBP)

    pool_mat = jnp.asarray(_pool_matrix(H, W, PH, PW))               # (HW, PP)
    x_flat = x.reshape(N, C, HW)                                     # (N, C, HW)

    # ---- fused kernel: in-VMEM im2col -> conv+bias -> ReLU -> avgpool ------
    def _kernel(w_ref, x_ref, pool_ref, out_ref, xs_ref):
        # Build the im2col patches for this image in VMEM scratch. The tail
        # columns of each shifted tap block and the padding rows stay zero
        # (finite), and the "garbage" conv positions they feed are killed by
        # the zero rows of the pool matrix.
        xs_ref[...] = jnp.zeros_like(xs_ref)
        xs_ref[K:K + 1, :] = jnp.ones((1, HW), jnp.float32)   # folded-bias row
        for t in range(NT):
            kh, kw = divmod(t, KW)
            s = kh * W + kw                                   # tap lane shift
            if s == 0:
                xs_ref[0:C, :] = x_ref[...]
            else:
                xs_ref[t * C:(t + 1) * C, 0:HW - s] = x_ref[:, s:HW]

        conv = jnp.dot(w_ref[...], xs_ref[...],
                       preferred_element_type=jnp.float32)     # (OC, HW)
        conv = jnp.maximum(conv, 0.0)                          # ReLU
        pooled = jnp.dot(conv, pool_ref[...],
                         preferred_element_type=jnp.float32)   # (OC, PP)
        out_ref[...] = pooled.astype(out_ref.dtype)

    flops = 2 * N * OC * HW * (KBP + PP)
    bytes_accessed = 4 * (x_flat.size + w_aug.size + pool_mat.size + N * OC * PP)

    out = pl.pallas_call(
        _kernel,
        out_shape=jax.ShapeDtypeStruct((N, OC, PP), jnp.float32),
        grid=(N,),
        in_specs=[
            pl.BlockSpec((OC, KBP), lambda i: (0, 0)),
            pl.BlockSpec((None, C, HW), lambda i: (i, 0, 0)),
            pl.BlockSpec((HW, PP), lambda i: (0, 0)),
        ],
        out_specs=pl.BlockSpec((None, OC, PP), lambda i: (i, 0, 0)),
        scratch_shapes=[pltpu.VMEM((KBP, HW), jnp.float32)],
        compiler_params=pltpu.CompilerParams(
            dimension_semantics=("parallel",)),
        cost_estimate=pl.CostEstimate(
            flops=flops, transcendentals=0, bytes_accessed=bytes_accessed),
    )(w_aug, x_flat, pool_mat)

    return out.reshape(N, OC, PH, PW)


def _reference(x, weight, bias):
    conv = lax.conv_general_dilated(
        x, weight, window_strides=(1, 1), padding="VALID",
        dimension_numbers=("NCHW", "OIHW", "NCHW"))
    conv = conv + bias[None, :, None, None]
    conv = jnp.maximum(conv, 0.0)
    pooled = lax.reduce_window(
        conv, 0.0, lax.add,
        window_dimensions=(1, 1, POOL, POOL),
        window_strides=(1, 1, POOL_STRIDE, POOL_STRIDE),
        padding="VALID") / float(POOL * POOL)
    return pooled


if __name__ == "__main__":
    key = jax.random.PRNGKey(0)
    kx, kw_, kb = jax.random.split(key, 3)

    N, C, H, W = 2, 4, 16, 16      # batch=2, input_channels=4, spatial=16
    OC = 8                         # output_channels=8

    x = jax.random.normal(kx, (N, C, H, W), dtype=jnp.float32)
    # Deterministic synthetic parameters (shapes match nn.Conv2d(C, OC, 3)).
    fan_in = C * KH * KW
    bound = 1.0 / np.sqrt(fan_in)
    weight = jax.random.uniform(kw_, (OC, C, KH, KW), jnp.float32, -bound, bound)
    bias = jax.random.uniform(kb, (OC,), jnp.float32, -bound, bound)

    out = jax.block_until_ready(cnn64x3_forward(x, weight, bias))
    ref = jax.block_until_ready(_reference(x, weight, bias))

    assert out.shape == ref.shape, (out.shape, ref.shape)
    np.testing.assert_allclose(np.asarray(out), np.asarray(ref),
                               rtol=1e-4, atol=1e-4)
    print("KERNEL_OK")
</pallas_src>

<mosaic_0001>
module attributes {stable_mosaic.version = 11 : i64} {
  func.func @_kernel(%arg0: i32, %arg1: memref<8x40xf32, #tpu.memory_space<vmem>>, %arg2: memref<1x4x256xf32, #tpu.memory_space<vmem>>, %arg3: memref<256x16xf32, #tpu.memory_space<vmem>>, %arg4: memref<1x8x16xf32, #tpu.memory_space<vmem>>, %arg5: memref<40x256xf32, #tpu.memory_space<vmem>>) attributes {dimension_semantics = [#tpu.dimension_semantics<parallel>], iteration_bounds = array<i64: 2>, scalar_prefetch = 0 : i64, scratch_operands = 1 : i64, tpu.core_type = #tpu.core_type<tc>, window_params = [{pipeline_mode = #tpu.pipeline_mode<synchronous>, transform_indices = @transform_0, window_bounds = array<i64: 8, 40>}, {transform_indices = @transform_1, window_bounds = array<i64: 1, 4, 256>}, {pipeline_mode = #tpu.pipeline_mode<synchronous>, transform_indices = @transform_2, window_bounds = array<i64: 256, 16>}, {transform_indices = @transform_3, window_bounds = array<i64: 1, 8, 16>}]} {
    %cst = arith.constant 0.000000e+00 : f32
    %0 = vector.broadcast %cst : f32 to vector<40x256xf32>
    %c0 = arith.constant 0 : index
    %c0_0 = arith.constant 0 : index
    %1 = vector.load %arg5[%c0, %c0_0] : memref<40x256xf32, #tpu.memory_space<vmem>>, vector<40x256xf32>
    tpu.vector_store %arg5[%c0, %c0_0], %0 {strides = array<i32>} : memref<40x256xf32, #tpu.memory_space<vmem>>, vector<40x256xf32>,
    %cst_1 = arith.constant 1.000000e+00 : f32
    %2 = vector.broadcast %cst_1 : f32 to vector<1x256xf32>
    %c36 = arith.constant 36 : index
    %c0_2 = arith.constant 0 : index
    %3 = vector.load %arg5[%c36, %c0_2] : memref<40x256xf32, #tpu.memory_space<vmem>>, vector<1x256xf32>
    tpu.vector_store %arg5[%c36, %c0_2], %2 {strides = array<i32>} : memref<40x256xf32, #tpu.memory_space<vmem>>, vector<1x256xf32>,
    %c0_3 = arith.constant 0 : index
    %c0_4 = arith.constant 0 : index
    %c0_5 = arith.constant 0 : index
    %4 = vector.load %arg2[%c0_3, %c0_4, %c0_5] : memref<1x4x256xf32, #tpu.memory_space<vmem>>, vector<1x4x256xf32>
    %5 = vector.shape_cast %4 : vector<1x4x256xf32> to vector<4x256xf32>
    %c0_6 = arith.constant 0 : index
    %c0_7 = arith.constant 0 : index
    %6 = vector.load %arg5[%c0_6, %c0_7] : memref<40x256xf32, #tpu.memory_space<vmem>>, vector<4x256xf32>
    tpu.vector_store %arg5[%c0_6, %c0_7], %5 {strides = array<i32>} : memref<40x256xf32, #tpu.memory_space<vmem>>, vector<4x256xf32>,
    %c0_8 = arith.constant 0 : index
    %c0_9 = arith.constant 0 : index
    %c1 = arith.constant 1 : index
    %7 = vector.load %arg2[%c0_8, %c0_9, %c1] : memref<1x4x256xf32, #tpu.memory_space<vmem>>, vector<1x4x255xf32>
    %8 = vector.shape_cast %7 : vector<1x4x255xf32> to vector<4x255xf32>
    %c4 = arith.constant 4 : index
    %c0_10 = arith.constant 0 : index
    %9 = vector.load %arg5[%c4, %c0_10] : memref<40x256xf32, #tpu.memory_space<vmem>>, vector<4x255xf32>
    tpu.vector_store %arg5[%c4, %c0_10], %8 {strides = array<i32>} : memref<40x256xf32, #tpu.memory_space<vmem>>, vector<4x255xf32>,
    %c0_11 = arith.constant 0 : index
    %c0_12 = arith.constant 0 : index
    %c2 = arith.constant 2 : index
    %10 = vector.load %arg2[%c0_11, %c0_12, %c2] : memref<1x4x256xf32, #tpu.memory_space<vmem>>, vector<1x4x254xf32>
    %11 = vector.shape_cast %10 : vector<1x4x254xf32> to vector<4x254xf32>
    %c8 = arith.constant 8 : index
    %c0_13 = arith.constant 0 : index
    %12 = vector.load %arg5[%c8, %c0_13] : memref<40x256xf32, #tpu.memory_space<vmem>>, vector<4x254xf32>
    tpu.vector_store %arg5[%c8, %c0_13], %11 {strides = array<i32>} : memref<40x256xf32, #tpu.memory_space<vmem>>, vector<4x254xf32>,
    %c0_14 = arith.constant 0 : index
    %c0_15 = arith.constant 0 : index
    %c16 = arith.constant 16 : index
    %13 = vector.load %arg2[%c0_14, %c0_15, %c16] : memref<1x4x256xf32, #tpu.memory_space<vmem>>, vector<1x4x240xf32>
    %14 = vector.shape_cast %13 : vector<1x4x240xf32> to vector<4x240xf32>
    %c12 = arith.constant 12 : index
    %c0_16 = arith.constant 0 : index
    %15 = vector.load %arg5[%c12, %c0_16] : memref<40x256xf32, #tpu.memory_space<vmem>>, vector<4x240xf32>
    tpu.vector_store %arg5[%c12, %c0_16], %14 {strides = array<i32>} : memref<40x256xf32, #tpu.memory_space<vmem>>, vector<4x240xf32>,
    %c0_17 = arith.constant 0 : index
    %c0_18 = arith.constant 0 : index
    %c17 = arith.constant 17 : index
    %16 = vector.load %arg2[%c0_17, %c0_18, %c17] : memref<1x4x256xf32, #tpu.memory_space<vmem>>, vector<1x4x239xf32>
    %17 = vector.shape_cast %16 : vector<1x4x239xf32> to vector<4x239xf32>
    %c16_19 = arith.constant 16 : index
    %c0_20 = arith.constant 0 : index
    %18 = vector.load %arg5[%c16_19, %c0_20] : memref<40x256xf32, #tpu.memory_space<vmem>>, vector<4x239xf32>
    tpu.vector_store %arg5[%c16_19, %c0_20], %17 {strides = array<i32>} : memref<40x256xf32, #tpu.memory_space<vmem>>, vector<4x239xf32>,
    %c0_21 = arith.constant 0 : index
    %c0_22 = arith.constant 0 : index
    %c18 = arith.constant 18 : index
    %19 = vector.load %arg2[%c0_21, %c0_22, %c18] : memref<1x4x256xf32, #tpu.memory_space<vmem>>, vector<1x4x238xf32>
    %20 = vector.shape_cast %19 : vector<1x4x238xf32> to vector<4x238xf32>
    %c20 = arith.constant 20 : index
    %c0_23 = arith.constant 0 : index
    %21 = vector.load %arg5[%c20, %c0_23] : memref<40x256xf32, #tpu.memory_space<vmem>>, vector<4x238xf32>
    tpu.vector_store %arg5[%c20, %c0_23], %20 {strides = array<i32>} : memref<40x256xf32, #tpu.memory_space<vmem>>, vector<4x238xf32>,
    %c0_24 = arith.constant 0 : index
    %c0_25 = arith.constant 0 : index
    %c32 = arith.constant 32 : index
    %22 = vector.load %arg2[%c0_24, %c0_25, %c32] : memref<1x4x256xf32, #tpu.memory_space<vmem>>, vector<1x4x224xf32>
    %23 = vector.shape_cast %22 : vector<1x4x224xf32> to vector<4x224xf32>
    %c24 = arith.constant 24 : index
    %c0_26 = arith.constant 0 : index
    %24 = vector.load %arg5[%c24, %c0_26] : memref<40x256xf32, #tpu.memory_space<vmem>>, vector<4x224xf32>
    tpu.vector_store %arg5[%c24, %c0_26], %23 {strides = array<i32>} : memref<40x256xf32, #tpu.memory_space<vmem>>, vector<4x224xf32>,
    %c0_27 = arith.constant 0 : index
    %c0_28 = arith.constant 0 : index
    %c33 = arith.constant 33 : index
    %25 = vector.load %arg2[%c0_27, %c0_28, %c33] : memref<1x4x256xf32, #tpu.memory_space<vmem>>, vector<1x4x223xf32>
    %26 = vector.shape_cast %25 : vector<1x4x223xf32> to vector<4x223xf32>
    %c28 = arith.constant 28 : index
    %c0_29 = arith.constant 0 : index
    %27 = vector.load %arg5[%c28, %c0_29] : memref<40x256xf32, #tpu.memory_space<vmem>>, vector<4x223xf32>
    tpu.vector_store %arg5[%c28, %c0_29], %26 {strides = array<i32>} : memref<40x256xf32, #tpu.memory_space<vmem>>, vector<4x223xf32>,
    %c0_30 = arith.constant 0 : index
    %c0_31 = arith.constant 0 : index
    %c34 = arith.constant 34 : index
    %28 = vector.load %arg2[%c0_30, %c0_31, %c34] : memref<1x4x256xf32, #tpu.memory_space<vmem>>, vector<1x4x222xf32>
    %29 = vector.shape_cast %28 : vector<1x4x222xf32> to vector<4x222xf32>
    %c32_32 = arith.constant 32 : index
    %c0_33 = arith.constant 0 : index
    %30 = vector.load %arg5[%c32_32, %c0_33] : memref<40x256xf32, #tpu.memory_space<vmem>>, vector<4x222xf32>
    tpu.vector_store %arg5[%c32_32, %c0_33], %29 {strides = array<i32>} : memref<40x256xf32, #tpu.memory_space<vmem>>, vector<4x222xf32>,
    %c0_34 = arith.constant 0 : index
    %c0_35 = arith.constant 0 : index
    %31 = vector.load %arg1[%c0_34, %c0_35] : memref<8x40xf32, #tpu.memory_space<vmem>>, vector<8x40xf32>
    %c0_36 = arith.constant 0 : index
    %c0_37 = arith.constant 0 : index
    %32 = vector.load %arg5[%c0_36, %c0_37] : memref<40x256xf32, #tpu.memory_space<vmem>>, vector<40x256xf32>
    %cst_38 = arith.constant dense<0.000000e+00> : vector<8x256xf32>
    %33 = tpu.matmul %31, %32, %cst_38 {dimension_numbers = #tpu.dot_dimension_numbers<[1], [0], [0], [1], [0, 0, 1, 1], [], []>} : vector<8x40xf32>, vector<40x256xf32>, vector<8x256xf32> -> vector<8x256xf32>
    %cst_39 = arith.constant 0.000000e+00 : f32
    %34 = vector.broadcast %cst_39 : f32 to vector<8x256xf32>
    %35 = arith.maximumf %33, %34 : vector<8x256xf32>
    %c0_40 = arith.constant 0 : index
    %c0_41 = arith.constant 0 : index
    %36 = vector.load %arg3[%c0_40, %c0_41] : memref<256x16xf32, #tpu.memory_space<vmem>>, vector<256x16xf32>
    %cst_42 = arith.constant dense<0.000000e+00> : vector<8x16xf32>
    %37 = tpu.matmul %35, %36, %cst_42 {dimension_numbers = #tpu.dot_dimension_numbers<[1], [0], [0], [1], [0, 0, 1, 1], [], []>} : vector<8x256xf32>, vector<256x16xf32>, vector<8x16xf32> -> vector<8x16xf32>
    %c0_43 = arith.constant 0 : index
    %c0_44 = arith.constant 0 : index
    %c0_45 = arith.constant 0 : index
    %38 = vector.load %arg4[%c0_43, %c0_44, %c0_45] : memref<1x8x16xf32, #tpu.memory_space<vmem>>, vector<1x8x16xf32>
    %39 = vector.shape_cast %38 : vector<1x8x16xf32> to vector<8x16xf32>
    %40 = vector.shape_cast %37 : vector<8x16xf32> to vector<1x8x16xf32>
    tpu.vector_store %arg4[%c0_43, %c0_44, %c0_45], %40 {strides = array<i32>} : memref<1x8x16xf32, #tpu.memory_space<vmem>>, vector<1x8x16xf32>,
    return
  }
  func.func @transform_0(%arg0: i32) -> (i32, i32) {
    %c0_i32 = arith.constant 0 : i32
    %c0_i32_0 = arith.constant 0 : i32
    %c0_i32_1 = arith.constant 0 : i32
    return %c0_i32, %c0_i32_0 : i32, i32
  }
  func.func @transform_1(%arg0: i32) -> (i32, i32, i32) {
    %c0_i32 = arith.constant 0 : i32
    %c0_i32_0 = arith.constant 0 : i32
    %c0_i32_1 = arith.constant 0 : i32
    return %arg0, %c0_i32, %c0_i32_0 : i32, i32, i32
  }
  func.func @transform_2(%arg0: i32) -> (i32, i32) {
    %c0_i32 = arith.constant 0 : i32
    %c0_i32_0 = arith.constant 0 : i32
    %c0_i32_1 = arith.constant 0 : i32
    return %c0_i32, %c0_i32_0 : i32, i32
  }
  func.func @transform_3(%arg0: i32) -> (i32, i32, i32) {
    %c0_i32 = arith.constant 0 : i32
    %c0_i32_0 = arith.constant 0 : i32
    %c0_i32_1 = arith.constant 0 : i32
    return %arg0, %c0_i32, %c0_i32_0 : i32, i32, i32
  }
}

</mosaic_0001>

<bundles_post_ra>
// kernel: cnn64x3_forward.1
= control target key start
LH: loop header
LB: loop body
LE: loop exit
PB: predicated region body
PF: predicated region fallthrough
CT: control target
= control target key end

     0   :  { %s580_s12 = smov 0   ;;  %s709_s0 = inlined_call_operand.vmem [shape: f32[8,40], index: 0, kind: input, shape index: {}]   ;;  %s710_s1 = inlined_call_operand.vmem [shape: f32[2,4,256], index: 1, kind: input, shape index: {}]   ;;  %s711_s2 = inlined_call_operand.vmem [shape: f32[256,16], index: 2, kind: input, shape index: {}]   ;;  %s712_s3 = inlined_call_operand.vmem [shape: f32[2,8,16], index: 3, kind: output, shape index: {}]  }
   0x1 LB: > { %s511_s13 = sadd.s32 4294967295, %s548_s12   ;;  %p515_p0 = scmp.ge.s32.totalorder %s548_s12, 1  ;;  %s548_s12 = sphi %s580_s12, %s13_s12  }
   0x2   : > { %p137_p1 = scmp.lt.s32.totalorder %s548_s12, 3 }
   0x4   : > { %p138_p2 = pnand %p515_p0, %p137_p1 }
   0x5   : > { %p160_p3 = scmp.lt.s32.totalorder (!%p138_p2), %s511_s13, 1  ;;  %s550_s18 = smov (!%p138_p2), 126  }
   0x6   : > { %141 = sbr.rel (%p138_p2) target bundleno = 491 (0x1eb), region = 32  ;;  %s551_s19 = smov (!%p138_p2), 112  }
   0x7   : > { %s552_s20 = smov (!%p138_p2), 111   ;;  %s553_s21 = smov (!%p138_p2), 110  }
   0x8   : > { %s554_s22 = smov (!%p138_p2), 96   ;;  %s555_s23 = smov (!%p138_p2), 95  }
   0x9   : > { %s556_s24 = smov (!%p138_p2), 94   ;;  %s557_s25 = smov (!%p138_p2), 127  }
   0xb   : > { %s714_s13 = smov (!%p160_p3, %s511_s13), 1  ;;  %vm226_vm0 = vcmask 1027072   ;;  %v558_v19 = vmov 0.0   ;;  %vm221_vm1 = vcmask 1031168   ;;  %vm259_vm2 = vcmask 904192   ;;  %v399_v38 = vld [vmem:[%s711_s2 + $0x78] sm:$0xff] }
   0xc   : > { %s523_s14 = sshll.u32 %s714_s13, 3  ;;  %171 = vst [vmem:[#allocation2 + $0x10] sm:$0xff] %v558_v19  ;;  %vm254_vm3 = vcmask 908288   ;;  %v179_v29 = vlaneseq  ;;  %v559_v30 = vmov 1.0   ;;  %vm271_vm5 = vcmask 900096   ;;  %v415_v39 = vld [vmem:[%s711_s2 + $0xf8] sm:$0xff]  ;;  %416 = vmatpush.msra.mxu2 %v399_v38 }
   0xd   : > { %s164_s17 = scalar_lea.vmem %s710_s1, %s523_s14  ;;  %172 = vst [vmem:[#allocation2 + $0x18] sm:$0xff] %v558_v19  ;;  %vm276_vm6 = vcmask 900100   ;;  %vm304_vm7 = vcmask 777216   ;;  %vm309_vm8 = vcmask 777220   ;;  %vm287_vm9 = vcmask 785408   ;;  %v398_v40 = vld [vmem:[%s711_s2 + $0x70] sm:$0xff]  ;;  %436 = vmatpush.msra.mxu3 %v415_v39 }
   0xe   : > { %v186_v0 = vld [vmem:[%s164_s17] sm:$0xff]  ;;  %169 = vst [vmem:[#allocation2] sm:$0xff] %v558_v19  ;;  %vm181_vm4 = vcmp.lt.s32.totalorder %v179_v29, 256  ;;  %vm292_vm10 = vcmask 781312   ;;  %v414_v41 = vld [vmem:[%s711_s2 + $0xf0] sm:$0xff]  ;;  %v397_v42 = vld [vmem:[%s711_s2 + $0x68] sm:$0xff]  ;;  %417 = vmatpush.msra.mxu2 %v398_v40 }
   0xf   : > { %188 = vst [vmem:[#allocation1] ss:$2 sm:$0xff] %v186_v0  ;;  %v413_v43 = vld [vmem:[%s711_s2 + $0xe8] sm:$0xff]  ;;  %vm238_vm11 = vcmask 916480   ;;  %vm243_vm12 = vcmask 916484   ;;  %437 = vmatpush.msra.mxu3 %v414_v41  ;;  %v396_v44 = vld [vmem:[%s711_s2 + $0x60] sm:$0xff] }
  0x10   : > { %170 = vst [vmem:[#allocation2 + $0x8] sm:$0xff] %v558_v19  ;;  %v412_v45 = vld [vmem:[%s711_s2 + $0xe0] sm:$0xff]  ;;  %418 = vmatpush.msra.mxu2 %v397_v42  ;;  %v395_v49 = vld [vmem:[%s711_s2 + $0x58] sm:$0xff]  ;;  %v394_v51 = vld [vmem:[%s711_s2 + $0x50] sm:$0xff]  ;;  %vm320_vm13 = vcmask 769024   ;;  %vm325_vm14 = vcmask 764928  }
  0x11   : > { %173 = vst [vmem:[#allocation2 + $0x20] sm:$0xff] %v558_v19  ;;  %438 = vmatpush.msra.mxu3 %v413_v43  ;;  %v411_v50 = vld [vmem:[%s711_s2 + $0xd8] sm:$0xff]  ;;  %v410_v52 = vld [vmem:[%s711_s2 + $0xd0] sm:$0xff]  ;;  %v393_v53 = vld [vmem:[%s711_s2 + $0x48] sm:$0xff]  ;;  %vm205_vm15 = vcmask 1039360  }
  0x12   : > { %174 = vst [vmem:[#allocation2 + $0x28] sm:$0xff] %v558_v19  ;;  %419 = vmatpush.msra.mxu2 %v396_v44  ;;  %v409_v54 = vld [vmem:[%s711_s2 + $0xc8] sm:$0xff]  ;;  %v392_v55 = vld [vmem:[%s711_s2 + $0x40] sm:$0xff]  ;;  %v391_v59 = vld [vmem:[%s711_s2 + $0x38] sm:$0xff] }
  0x13   : > { %175 = vst [vmem:[#allocation2 + $0x30] sm:$0xff] %v558_v19  ;;  %439 = vmatpush.msra.mxu3 %v412_v45  ;;  %v408_v56 = vld [vmem:[%s711_s2 + $0xc0] sm:$0xff]  ;;  %v407_v60 = vld [vmem:[%s711_s2 + $0xb8] sm:$0xff]  ;;  %v390_v61 = vld [vmem:[%s711_s2 + $0x30] sm:$0xff] }
  0x14   : > { %176 = vst [vmem:[#allocation2 + $0x38] sm:$0xff] %v558_v19  ;;  %420 = vmatpush.msra.mxu2 %v395_v49  ;;  %v406_v62 = vld [vmem:[%s711_s2 + $0xb0] sm:$0xff]  ;;  %v389_v63 = vld [vmem:[%s711_s2 + $0x28] sm:$0xff] }
  0x15   : > { %177 = vst [vmem:[#allocation2 + $0x40] sm:$0xff] %v558_v19  ;;  %440 = vmatpush.msra.mxu3 %v411_v50 }
  0x16   : > { %v596_v1 = vld.sshfl [vmem:[#allocation1] sm:$0xff pattern:$0x75316420]  ;;  %v598_v2 = vld.sshfl [vmem:[#allocation1 + $0x8] sm:$0xff pattern:$0x75316420]  ;;  %421 = vmatpush.msra.mxu2 %v394_v51 }
  0x17   : > { %198 = vst [vmem:[#allocation1 + $0x1] ss:$2 sm:$0xff] %v186_v0  ;;  %441 = vmatpush.msra.mxu3 %v410_v52 }
  0x18   : > { %178 = vst [vmem:[#allocation2 + $0x48] sm:$0xff] %v558_v19  ;;  %422 = vmatpush.msra.mxu2 %v393_v53 }
  0x19   : > { %193 = vst [vmem:[#allocation2] sm:$0xf] %v596_v1  ;;  %442 = vmatpush.msra.mxu3 %v409_v54 }
  0x1a   : > { %194 = vst [vmem:[#allocation2 + $0x8] sm:$0xf] %v598_v2  ;;  %423 = vmatpush.msra.mxu2 %v392_v55  ;;  %v388_v2 = vld [vmem:[%s711_s2 + $0x20] sm:$0xff] }
  0x1b   : > { %184 = vst.msk [vmem:[#allocation2 + $0x44] ss:$8 sm:$0x3] %vm181_vm4, %v559_v30  ;;  %443 = vmatpush.msra.mxu3 %v408_v56 }
  0x1c   : > { %424 = vmatpush.msra.mxu2 %v391_v59 }
  0x1d   : > { %444 = vmatpush.msra.mxu3 %v407_v60 }
  0x1e   : > { %v199_v3 = vld.sshfl [vmem:[#allocation1] sm:$0xff pattern:$0x75316420]  ;;  %v200_v4 = vld.sshfl [vmem:[#allocation1 + $0x8] sm:$0xff pattern:$0x75316420]  ;;  %425 = vmatpush.msra.mxu2 %v390_v61 }
  0x1f   : > { %214 = vst [vmem:[#allocation1] ss:$2 sm:$0xff] %v186_v0  ;;  %445 = vmatpush.msra.mxu3 %v406_v62 }
  0x20   : > { %426 = vmatpush.msra.mxu2 %v389_v63 }
  0x22   : > { %427 = vmatpush.msra.mxu2 %v388_v2 }
  0x26   : > { %v215_v5 = vld.sshfl [vmem:[#allocation1] sm:$0xff pattern:$0x75316420]  ;;  %v216_v6 = vld.sshfl [vmem:[#allocation1 + $0x8] sm:$0xff pattern:$0x75316420] }
  0x27   : > { %217 = vrot.lane.b32.xlu1 %v215_v5, %s550_s18  ;;  %231 = vst [vmem:[#allocation1 + $0x1] ss:$2 sm:$0xff] %v186_v0  ;;  %219 = vrot.lane.b32.xlu2 %v216_v6, %s550_s18  ;;  %v404_v5 = vld [vmem:[%s711_s2 + $0xa0] sm:$0xff] }
  0x2e   : > { %v232_v7 = vld.sshfl [vmem:[#allocation1] sm:$0xff pattern:$0x75316420]  ;;  %v233_v8 = vld.sshfl [vmem:[#allocation1 + $0x8] sm:$0xff pattern:$0x75316420] }
  0x2f   : > { %234 = vrot.lane.b32.xlu0 %v232_v7, %s551_s19  ;;  %247 = vst [vmem:[#allocation1] ss:$2 sm:$0xff] %v186_v0 }
  0x36   : > { %v249_v9 = vld.sshfl [vmem:[#allocation1 + $0x8] sm:$0xff pattern:$0x75316420]  ;;  %v248_v10 = vld.sshfl [vmem:[#allocation1] sm:$0xff pattern:$0x75316420] }
  0x37   : > { %252 = vrot.lane.b32.xlu1 %v249_v9, %s552_s20  ;;  %250 = vrot.lane.b32.xlu0 %v248_v10, %s552_s20  ;;  %264 = vst [vmem:[#allocation1 + $0x1] ss:$2 sm:$0xff] %v186_v0  ;;  %v403_v10 = vld [vmem:[%s711_s2 + $0x98] sm:$0xff] }
  0x3e   : > { %v266_v11 = vld.sshfl [vmem:[#allocation1 + $0x8] sm:$0xff pattern:$0x75316420]  ;;  %v265_v12 = vld.sshfl [vmem:[#allocation1] sm:$0xff pattern:$0x75316420] }
  0x3f   : > { %269 = vrot.lane.b32.xlu0 %v266_v11, %s553_s21  ;;  %280 = vst [vmem:[#allocation1] ss:$2 sm:$0xff] %v186_v0  ;;  %267 = vrot.lane.b32.xlu2 %v265_v12, %s553_s21  ;;  %v386_v12 = vld [vmem:[%s711_s2 + $0x10] sm:$0xff] }
  0x46   : > { %v281_v13 = vld.sshfl [vmem:[#allocation1] sm:$0xff pattern:$0x75316420]  ;;  %v282_v14 = vld.sshfl [vmem:[#allocation1 + $0x8] sm:$0xff pattern:$0x75316420] }
  0x47   : > { %283 = vrot.lane.b32.xlu1 %v281_v13, %s554_s22  ;;  %297 = vst [vmem:[#allocation1 + $0x1] ss:$2 sm:$0xff] %v186_v0 }
  0x4e   : > { %v298_v15 = vld.sshfl [vmem:[#allocation1] sm:$0xff pattern:$0x75316420]  ;;  %v299_v16 = vld.sshfl [vmem:[#allocation1 + $0x8] sm:$0xff pattern:$0x75316420] }
  0x4f   : > { %285 = vrot.lane.b32.xlu1 %v282_v14, %s554_s22  ;;  %313 = vst [vmem:[#allocation1] ss:$2 sm:$0xff] %v186_v0  ;;  %300 = vrot.lane.b32.xlu2 %v298_v15, %s555_s23  ;;  %v405_v0 = vld [vmem:[%s711_s2 + $0xa8] sm:$0xff]  ;;  %v402_v14 = vld [vmem:[%s711_s2 + $0x90] sm:$0xff]  ;;  %s168_s22 = scalar_lea.vmem %s712_s3, %s523_s14 }
  0x50   : > { %446 = vmatpush.msra.mxu3 %v405_v0 }
  0x52   : > { %447 = vmatpush.msra.mxu3 %v404_v5 }
  0x54   : > { %448 = vmatpush.msra.mxu3 %v403_v10 }
  0x56   : > { %v314_v17 = vld.sshfl [vmem:[#allocation1] sm:$0xff pattern:$0x75316420]  ;;  %v315_v18 = vld.sshfl [vmem:[#allocation1 + $0x8] sm:$0xff pattern:$0x75316420]  ;;  %449 = vmatpush.msra.mxu3 %v402_v14 }
  0x57   : > { %236 = vrot.lane.b32.xlu1 %v233_v8, %s551_s19  ;;  %316 = vrot.lane.b32.xlu0 %v314_v17, %s556_s24  ;;  %v387_v8 = vld [vmem:[%s711_s2 + $0x18] sm:$0xff] }
  0x58   : > { %302 = vrot.lane.b32.xlu2 %v299_v16, %s555_s23  ;;  %428 = vmatpush.msra.mxu2 %v387_v8 }
  0x5a   : > { %429 = vmatpush.msra.mxu2 %v386_v12 }
  0x5f   : > { %318 = vrot.lane.b32.xlu0 %v315_v18, %s556_s24  ;;  %v327_v18 = vld [vmem:[%s709_s0] sm:$0xff] }
  0x60   : > { %201 = vrot.lane.b32.xlu2 %v199_v3, %s557_s25 }
  0x67   : > { %203 = vrot.lane.b32.xlu0 %v200_v4, %s557_s25 }
  0x81   : > { %v220_v20 = vpop.permute.xlu2 %219 }
  0x82   : > { %227 = vst.msk [vmem:[#allocation2 + $0x18] sm:$0xf] %vm226_vm0, %v220_v20  ;;  %vm210_vm0 = vcmask 1039364  }
  0x99   : > { %v218_v21 = vpop.permute.xlu1 %217  ;;  %v268_v23 = vpop.permute.xlu2 %267 }
  0x9a   : > { %v222_v22 = vsel %vm221_vm1, %v218_v21, %v220_v20  ;;  %vm338_vm1 = vcmask 326656   ;;  %v385_v21 = vld [vmem:[%s711_s2 + $0x8] sm:$0xff] }
  0x9b   : > { %225 = vst [vmem:[#allocation2 + $0x10] sm:$0xf] %v222_v22  ;;  %v401_v22 = vld [vmem:[%s711_s2 + $0x88] sm:$0xff]  ;;  %430 = vmatpush.msra.mxu2 %v385_v21 }
  0x9c   : > { %450 = vmatpush.msra.mxu3 %v401_v22 }
  0xa1   : > { %v235_v24 = vpop.permute.xlu0 %234 }
  0xa9   : > { %v253_v25 = vpop.permute.xlu1 %252  ;;  %v251_v26 = vpop.permute.xlu0 %250 }
  0xaa   : > { %260 = vst.msk [vmem:[#allocation2 + $0x28] sm:$0xf] %vm259_vm2, %v253_v25  ;;  %v255_v27 = vsel %vm254_vm3, %v251_v26, %v253_v25  ;;  %v301_v28 = vpop.permute.xlu2 %300  ;;  %vm456_vm2 = vcmask 130048  }
  0xab   : > { %258 = vst [vmem:[#allocation2 + $0x20] sm:$0xf] %v255_v27 }
  0xb1   : > { %v270_v31 = vpop.permute.xlu0 %269 }
  0xb2   : > { %v272_v32 = vsel %vm271_vm5, %v268_v23, %v270_v31  ;;  %277 = vst.msk [vmem:[#allocation2 + $0x28] sm:$0xf0] %vm276_vm6, %v270_v31  ;;  %v303_v33 = vpop.permute.xlu2 %302  ;;  %v384_v23 = vld [vmem:[%s711_s2] sm:$0xff] }
  0xb3   : > { %275 = vst [vmem:[#allocation2 + $0x20] sm:$0xf0] %v272_v32  ;;  %v305_v34 = vsel %vm304_vm7, %v301_v28, %v303_v33  ;;  %431 = vmatpush.msra.mxu2 %v384_v23 }
  0xb4   : > { %308 = vst [vmem:[#allocation2 + $0x30] sm:$0xf0] %v305_v34 }
  0xb5   : > { %310 = vst.msk [vmem:[#allocation2 + $0x38] sm:$0xf0] %vm309_vm8, %v303_v33 }
  0xb9   : > { %v284_v35 = vpop.permute.xlu1 %283  ;;  %v333_v13 = vld [vmem:[#allocation2 + $0x28] sm:$0xff] }
  0xba   : > { %v202_v1 = vpop.permute.xlu2 %201  ;;  %v332_v15 = vld [vmem:[#allocation2 + $0x20] sm:$0xff] }
  0xc1   : > { %v286_v36 = vpop.permute.xlu1 %285 }
  0xc2   : > { %v288_v37 = vsel %vm287_vm9, %v284_v35, %v286_v36  ;;  %293 = vst.msk [vmem:[#allocation2 + $0x38] sm:$0xf] %vm292_vm10, %v286_v36 }
  0xc3   : > { %291 = vst [vmem:[#allocation2 + $0x30] sm:$0xf] %v288_v37 }
  0xc9   : > { %v237_v46 = vpop.permute.xlu1 %236  ;;  %v317_v47 = vpop.permute.xlu0 %316  ;;  %v335_v9 = vld [vmem:[#allocation2 + $0x38] sm:$0xff] }
  0xca   : > { %v239_v48 = vsel %vm238_vm11, %v235_v24, %v237_v46  ;;  %244 = vst.msk [vmem:[#allocation2 + $0x18] sm:$0xf0] %vm243_vm12, %v237_v46  ;;  %v334_v11 = vld [vmem:[#allocation2 + $0x30] sm:$0xff]  ;;  %v400_v24 = vld [vmem:[%s711_s2 + $0x80] sm:$0xff] }
  0xcb   : > { %242 = vst [vmem:[#allocation2 + $0x10] sm:$0xf0] %v239_v48  ;;  %451 = vmatpush.msra.mxu3 %v400_v24 }
  0xd1   : > { %v319_v57 = vpop.permute.xlu0 %318  ;;  %v331_v16 = vld [vmem:[#allocation2 + $0x18] sm:$0xff] }
  0xd2   : > { %v321_v58 = vsel %vm320_vm13, %v317_v47, %v319_v57  ;;  %326 = vst.msk [vmem:[#allocation2 + $0x48] sm:$0xf] %vm325_vm14, %v319_v57  ;;  %v330_v17 = vld [vmem:[#allocation2 + $0x10] sm:$0xff] }
  0xd3   : > { %324 = vst [vmem:[#allocation2 + $0x40] sm:$0xf] %v321_v58 }
  0xd9   : > { %v204_v3 = vpop.permute.xlu0 %203  ;;  %v337_v4 = vld [vmem:[#allocation2 + $0x48] sm:$0xff] }
  0xda   : > { %v206_v6 = vsel %vm205_vm15, %v202_v1, %v204_v3  ;;  %211 = vst.msk [vmem:[#allocation2 + $0x8] sm:$0xf0] %vm210_vm0, %v204_v3  ;;  %373 = vmatpush.msra.mxu1 %v337_v4  ;;  %v336_v7 = vld [vmem:[#allocation2 + $0x40] sm:$0xff] }
  0xdb   : > { %209 = vst [vmem:[#allocation2] sm:$0xf0] %v206_v6  ;;  %353 = vmatpush.msra.mxu0 %v336_v7 }
  0xdc   : > { %374 = vmatpush.msra.mxu1 %v335_v9 }
  0xdd   : > { %354 = vmatpush.msra.mxu0 %v334_v11 }
  0xde   : > { %375 = vmatpush.msra.mxu1 %v333_v13 }
  0xdf   : > { %355 = vmatpush.msra.mxu0 %v332_v15 }
  0xe0   : > { %376 = vmatpush.msra.mxu1 %v331_v16 }
  0xe1   : > { %356 = vmatpush.msra.mxu0 %v330_v17  ;;  %v329_v19 = vld [vmem:[#allocation2 + $0x8] sm:$0xff] }
  0xe2   : > { %377 = vmatpush.msra.mxu1 %v329_v19  ;;  %v328_v20 = vld [vmem:[#allocation2] sm:$0xff] }
  0xe3   : > { %357 = vmatpush.msra.mxu0 %v328_v20  ;;  %520 = vmatmul.msk.f32.vlgmr.msra.gmra.mxu1 %vm338_vm1, %v327_v18 }
  0xe4   : > { %519 = vmatmul.msk.f32.vlgmr.msra.gmra.mxu0 %vm338_vm1, %v327_v18 }
 0x160   : > { %v379_v25 = vpop.f32.mrf.mxu1 }
 0x161   : > { %v359_v26 = vpop.f32.mrf.mxu0  ;;  %v383_v27 = vmax.f32 %v379_v25, 0.0 }
 0x162   : > { %v382_v28 = vmax.f32 %v359_v26, 0.0 }
 0x163   : > { %452 = vmatmul.f32.vlgmr.msra.gmra.mxu3 %v383_v27 }
 0x164   : > { %432 = vmatmul.f32.vlgmr.msra.gmra.mxu2 %v382_v28 }
 0x1e6   : > { %v453_v29 = vpop.f32.mrf.mxu3 }
 0x1e7   : > { %v433_v30 = vpop.f32.mrf.mxu2 }
 0x1e8   : > { %v454_v31 = vadd.f32 %v453_v29, %v433_v30 }
 0x1ea   : > { %457 = vst.msk [vmem:[%s168_s22] sm:$0xff] %vm456_vm2, %v454_v31 }
 0x1eb PF: > { %s13_s12 = sadd.s32 1, %s548_s12  }
 0x1ec   : > { %p10_p4 = scmp.ge.s32.totalorder %s13_s12, 4  }
 0x1ee   :  { %12 = sbr.rel (!%p10_p4) target bundleno = 1 (0x1), region = 67 }

</bundles_post_ra>
